<compile_context>
chip_gen: v7x
topology: tpu7x:2x2x1
jax: 0.10.0
libtpu: 0.0.40
codegen_flags: <defaults>
</compile_context>

<pallas_src>
import functools

import jax
import jax.numpy as jnp
from jax.experimental import pallas as pl
from jax.experimental.pallas import tpu as pltpu


# ---------------------------------------------------------------------------
# Kernel: per-row soft cross entropy losses for one (rows, k) problem
# ---------------------------------------------------------------------------

def _soft_ce_row_loss_kernel(*refs, has_weight, lane_out):
    if has_weight:
        x_ref, t_ref, w_ref, o_ref = refs
    else:
        x_ref, t_ref, o_ref = refs

    x = x_ref[...].astype(jnp.float32)                     # (tm, k) logits
    t = t_ref[...].astype(jnp.float32)                     # (tm, k) target probabilities

    m = jnp.max(x, axis=-1, keepdims=True)                 # (tm, 1)
    lse = m + jnp.log(jnp.sum(jnp.exp(x - m), axis=-1, keepdims=True))
    per_elem = t * (lse - x)                                # (tm, k)
    if has_weight:
        # Class axis is reduced in-kernel (per-row output), so the weight must be applied here;
        # it is one VPU mul/element, hidden under the HBM-bound input pipeline.
        per_elem = per_elem * w_ref[...].astype(jnp.float32)    # (1, k) broadcast

    row_loss = jnp.sum(per_elem, axis=-1)                   # (tm,)

    if lane_out:
        # Lane-dense 1-D store; the sublane->lane relayout goes to the XLU (has slack here).
        o_ref[...] = row_loss
    else:
        # Narrow-store fallback (vocab-scale k where the row tile is < 128 rows).
        o_ref[...] = row_loss[:, None]                      # (tm, 1)


# ---------------------------------------------------------------------------
# Tile / VMEM sizing
# ---------------------------------------------------------------------------

def _vmem_capacity_bytes():
    try:
        cap = int(getattr(pltpu.get_tpu_info(), "vmem_capacity_bytes", 0) or 0)
        if cap > 0:
            return cap
    except Exception:
        pass
    # Per-generation fallback if the query is unavailable.
    try:
        kind = jax.devices()[0].device_kind.lower()
    except Exception:
        kind = ""
    if "v2" in kind or "v3" in kind:
        return 16 << 20
    if "v7" in kind:
        return 64 << 20          # v7x: 64 MiB per TensorCore
    return 128 << 20             # v4 / v5e / v5p / v6e


def _choose_tile(n_rows, k, x_bytes, t_bytes, force_tm=None):
    """Pick the row tile tm from VMEM capacity, counting the f32 in-kernel working set."""
    cap = _vmem_capacity_bytes()
    # f32 temporaries per element: per_elem + exp buffer (+ upcast copies of sub-f32 inputs).
    f32_tiles = 2 + (1 if x_bytes < 4 else 0) + (1 if t_bytes < 4 else 0)
    # Inputs are double-buffered in their native dtype; f32 temporaries are single-buffered.
    bytes_per_row = k * (2 * (x_bytes + t_bytes) + 4 * f32_tiles)

    if force_tm is not None:
        tm = int(min(force_tm, n_rows))
    else:
        budget = max((cap * 3) // 4 - (8 << 20), 4 << 20)   # headroom for outputs/weight/scratch
        tm = max(int(budget // bytes_per_row), 1)
        if tm >= n_rows:
            tm = n_rows                                     # single full-height tile
        elif tm >= 128:
            tm = (tm // 128) * 128                          # lane-dense 1-D out block needs 128|tm
        else:
            # TODO(synk): class-tiled online logsumexp would keep tm large for vocab-scale k.
            tm = max((tm // 8) * 8, 8)

    grid = pl.cdiv(n_rows, tm)
    lane_out = (grid == 1) or (tm % 128 == 0)
    need = tm * bytes_per_row + 2 * tm * 4 + 4 * k * 4 + (8 << 20)
    vmem_limit = int(min(cap, max(need, 32 << 20)))
    return tm, grid, vmem_limit, lane_out


# ---------------------------------------------------------------------------
# Per-(rows, k) problem driver
# ---------------------------------------------------------------------------

def _row_losses(x2d, t2d, w, *, force_tm=None):
    """Per-row soft-CE losses for a single (M, k) problem via one pallas_call.  Returns (M,) f32."""
    M, k = x2d.shape
    xb = jnp.dtype(x2d.dtype).itemsize
    tb = jnp.dtype(t2d.dtype).itemsize
    tm, grid, vmem_limit, lane_out = _choose_tile(M, k, xb, tb, force_tm=force_tm)
    has_weight = w is not None

    args = [x2d, t2d]
    in_specs = [pl.BlockSpec((tm, k), lambda g: (g, 0)),
                pl.BlockSpec((tm, k), lambda g: (g, 0))]
    if has_weight:
        in_specs.append(pl.BlockSpec((1, k), lambda g: (0, 0)))
        args.append(w)

    cparams = pltpu.CompilerParams(
        dimension_semantics=("parallel",),          # single flat row-tile axis: v7x TCs split it
        vmem_limit_bytes=vmem_limit,
    )

    def run(lane):
        if lane:
            out_shape = jax.ShapeDtypeStruct((grid * tm,), jnp.float32)
            out_spec = pl.BlockSpec((tm,), lambda g: (g,))
        else:
            out_shape = jax.ShapeDtypeStruct((grid * tm, 1), jnp.float32)
            out_spec = pl.BlockSpec((tm, 1), lambda g: (g, 0))
        kern = functools.partial(_soft_ce_row_loss_kernel,
                                 has_weight=has_weight, lane_out=lane)
        return pl.pallas_call(
            kern,
            out_shape=out_shape,
            grid=(grid,),
            in_specs=in_specs,
            out_specs=out_spec,
            compiler_params=cparams,
        )(*args)

    if lane_out:
        try:
            return run(True)[:M]
        except Exception:
            # Safety net: fall back to the narrow-output layout if this Mosaic version rejects
            # the sublane->lane relayout on the 1-D store.
            pass
    return run(False)[:M, 0]


# ---------------------------------------------------------------------------
# Public wrapper (mirrors MTSoftCrossEntropyLoss.forward)
# ---------------------------------------------------------------------------

_FUSE_BYTES = 4 << 20   # fuse same-shape tasks into one call only when the copy is negligible


def mt_soft_cross_entropy_loss(inputs, targets, weight=None, reduction="mean"):
    """JAX/Pallas equivalent of MTSoftCrossEntropyLoss.forward.

    inputs:  dict task -> [n, k] float logits (any float dtype; streamed native over HBM)
    targets: dict task -> [n, k] float target probabilities
    weight:  optional length-k per-class weights (shared across tasks)
    """
    if reduction not in ("none", "mean", "sum"):
        raise ValueError(f"Unrecognized reduction: {reduction}")

    # Group same-shape/dtype tasks (they can share one fused pallas_call when small).
    groups = {}
    for task in targets.keys():
        x = jnp.asarray(inputs[task])
        t = jnp.asarray(targets[task])
        if x.ndim != 2 or x.shape != t.shape:
            raise ValueError(f"task {task!r}: expected matching [n, k] inputs/targets, "
                             f"got {x.shape} vs {t.shape}")
        groups.setdefault((x.shape, x.dtype, t.dtype), []).append((x, t))

    total = None
    for (shape, _, _), pairs in groups.items():
        n, k = shape
        w = None
        if weight is not None:
            w = jnp.asarray(weight, jnp.float32).reshape(-1)
            if w.shape[0] != k:
                raise ValueError(f"weight has length {w.shape[0]} but there are {k} classes")
            w = w.reshape(1, k)

        group_bytes = sum(int(px.size) * px.dtype.itemsize + int(pt.size) * pt.dtype.itemsize
                          for px, pt in pairs)
        if len(pairs) > 1 and group_bytes <= _FUSE_BYTES:
            # Small same-shape tasks: concatenate rows -> one fused call for the group.
            xs = jnp.concatenate([px for px, _ in pairs], axis=0)
            ts = jnp.concatenate([pt for _, pt in pairs], axis=0)
            rows = _row_losses(xs, ts, w).reshape(len(pairs), n)
        else:
            # Large tasks: one call per task avoids an HBM copy of the full inputs.
            rows = jnp.stack([_row_losses(px, pt, w) for px, pt in pairs])

        if reduction == "none":
            res = jnp.sum(rows, axis=0)            # (n,) summed over tasks
        elif reduction == "mean":
            res = jnp.sum(rows) / n                # per-task mean then sum == total_sum / n
        else:
            res = jnp.sum(rows)
        total = res if total is None else total + res
    return total


# ---------------------------------------------------------------------------
# Pure-jnp reference (mirrors the PyTorch module)
# ---------------------------------------------------------------------------

def _reference(inputs, targets, weight=None, reduction="mean"):
    total = None
    for task in targets.keys():
        x = jnp.asarray(inputs[task], jnp.float32)
        t = jnp.asarray(targets[task], jnp.float32)
        lse = jax.scipy.special.logsumexp(x, axis=-1, keepdims=True)
        ce_per_class = lse - x
        if weight is not None:
            ce_per_class = ce_per_class * jnp.asarray(weight, jnp.float32)[None, : x.shape[1]]
        cum = jnp.sum(t * ce_per_class, axis=-1)
        if reduction == "mean":
            cum = jnp.mean(cum)
        elif reduction == "sum":
            cum = jnp.sum(cum)
        total = cum if total is None else total + cum
    return total


if __name__ == "__main__":
    key = jax.random.PRNGKey(0)
    n, k = 16, 4

    k1, k2, k3, k4, k5, k6 = jax.random.split(key, 6)
    inputs = {
        "task_a": jax.random.normal(k1, (n, k), jnp.float32),
        "task_b": jax.random.normal(k2, (n, k), jnp.float32),
    }
    targets = {
        "task_a": jax.nn.softmax(jax.random.normal(k3, (n, k), jnp.float32), axis=-1),
        "task_b": jax.nn.softmax(jax.random.normal(k4, (n, k), jnp.float32), axis=-1),
    }
    class_weight = jnp.linspace(0.5, 2.0, k, dtype=jnp.float32)

    # All reductions, with class weights.
    for reduction in ("mean", "sum", "none"):
        got = jax.block_until_ready(
            mt_soft_cross_entropy_loss(inputs, targets, weight=class_weight, reduction=reduction))
        ref = _reference(inputs, targets, weight=class_weight, reduction=reduction)
        assert jnp.allclose(got, ref, rtol=1e-5, atol=1e-5), (reduction, got, ref)

    # weight=None specialization (no weight input stream).
    got = jax.block_until_ready(mt_soft_cross_entropy_loss(inputs, targets, reduction="mean"))
    ref = _reference(inputs, targets, reduction="mean")
    assert jnp.allclose(got, ref, rtol=1e-5, atol=1e-5), (got, ref)

    # bf16 logits/targets stay bf16 over HBM (f32 math in-kernel) — loose tolerance vs f32 ref.
    inputs_bf16 = {t: v.astype(jnp.bfloat16) for t, v in inputs.items()}
    targets_bf16 = {t: v.astype(jnp.bfloat16) for t, v in targets.items()}
    got = jax.block_until_ready(
        mt_soft_cross_entropy_loss(inputs_bf16, targets_bf16,
                                   weight=class_weight, reduction="mean"))
    ref = _reference(inputs, targets, weight=class_weight, reduction="mean")
    assert jnp.allclose(got, ref, rtol=3e-2, atol=3e-2), (got, ref)

    # Multi-tile path (grid > 1, lane-dense padded 1-D output, partial last tile sliced off)
    # and the narrow-output fallback path, exercised via a forced small row tile.
    xg = jax.random.normal(k5, (300, 8), jnp.float32)
    tg = jax.nn.softmax(jax.random.normal(k6, (300, 8), jnp.float32), axis=-1)
    ref_rows = _reference({"t": xg}, {"t": tg}, reduction="none")
    got_rows = jax.block_until_ready(_row_losses(xg, tg, None, force_tm=128))
    assert jnp.allclose(got_rows, ref_rows, rtol=1e-5, atol=1e-5)
    got_rows = jax.block_until_ready(_row_losses(xg, tg, None, force_tm=8))
    assert jnp.allclose(got_rows, ref_rows, rtol=1e-5, atol=1e-5)

    print("KERNEL_OK")
</pallas_src>

<mosaic_0001>
module attributes {stable_mosaic.version = 11 : i64} {
  func.func @_soft_ce_row_loss_kernel(%arg0: i32, %arg1: memref<32x4xf32, #tpu.memory_space<vmem>>, %arg2: memref<32x4xf32, #tpu.memory_space<vmem>>, %arg3: memref<1x4xf32, #tpu.memory_space<vmem>>, %arg4: memref<32x1xf32, #tpu.memory_space<vmem>>) attributes {dimension_semantics = [#tpu.dimension_semantics<parallel>], iteration_bounds = array<i64: 1>, scalar_prefetch = 0 : i64, scratch_operands = 0 : i64, tpu.core_type = #tpu.core_type<tc>, window_params = [{transform_indices = @transform_0, window_bounds = array<i64: 32, 4>}, {transform_indices = @transform_1, window_bounds = array<i64: 32, 4>}, {pipeline_mode = #tpu.pipeline_mode<synchronous>, transform_indices = @transform_2, window_bounds = array<i64: 1, 4>}, {transform_indices = @transform_3, window_bounds = array<i64: 32, 1>}]} {
    %c0 = arith.constant 0 : index
    %c0_0 = arith.constant 0 : index
    %0 = vector.load %arg1[%c0, %c0_0] : memref<32x4xf32, #tpu.memory_space<vmem>>, vector<32x4xf32>
    %c0_1 = arith.constant 0 : index
    %c0_2 = arith.constant 0 : index
    %1 = vector.load %arg2[%c0_1, %c0_2] : memref<32x4xf32, #tpu.memory_space<vmem>>, vector<32x4xf32>
    %cst = arith.constant dense<0xFF800000> : vector<32xf32>
    %2 = vector.multi_reduction <maximumf>, %0, %cst [1] : vector<32x4xf32> to vector<32xf32>
    %3 = vector.shape_cast %2 : vector<32xf32> to vector<32x1xf32>
    %4 = vector.broadcast %3 : vector<32x1xf32> to vector<32x4xf32>
    %5 = arith.subf %0, %4 : vector<32x4xf32>
    %6 = math.exp %5 : vector<32x4xf32>
    %cst_3 = arith.constant dense<0.000000e+00> : vector<32xf32>
    %7 = vector.multi_reduction <add>, %6, %cst_3 [1] : vector<32x4xf32> to vector<32xf32>
    %8 = vector.shape_cast %7 : vector<32xf32> to vector<32x1xf32>
    %9 = math.log %8 : vector<32x1xf32>
    %10 = arith.addf %3, %9 : vector<32x1xf32>
    %11 = vector.broadcast %10 : vector<32x1xf32> to vector<32x4xf32>
    %12 = arith.subf %11, %0 : vector<32x4xf32>
    %13 = arith.mulf %1, %12 : vector<32x4xf32>
    %c0_4 = arith.constant 0 : index
    %c0_5 = arith.constant 0 : index
    %14 = vector.load %arg3[%c0_4, %c0_5] : memref<1x4xf32, #tpu.memory_space<vmem>>, vector<1x4xf32>
    %15 = vector.broadcast %14 : vector<1x4xf32> to vector<32x4xf32>
    %16 = arith.mulf %13, %15 : vector<32x4xf32>
    %cst_6 = arith.constant dense<0.000000e+00> : vector<32xf32>
    %17 = vector.multi_reduction <add>, %16, %cst_6 [1] : vector<32x4xf32> to vector<32xf32>
    %18 = vector.shape_cast %17 : vector<32xf32> to vector<32x1xf32>
    %c0_7 = arith.constant 0 : index
    %c0_8 = arith.constant 0 : index
    %19 = vector.load %arg4[%c0_7, %c0_8] : memref<32x1xf32, #tpu.memory_space<vmem>>, vector<32x1xf32>
    tpu.vector_store %arg4[%c0_7, %c0_8], %18 {strides = array<i32>} : memref<32x1xf32, #tpu.memory_space<vmem>>, vector<32x1xf32>,
    return
  }
  func.func @transform_0(%arg0: i32) -> (i32, i32) {
    %c0_i32 = arith.constant 0 : i32
    %c0_i32_0 = arith.constant 0 : i32
    return %arg0, %c0_i32 : i32, i32
  }
  func.func @transform_1(%arg0: i32) -> (i32, i32) {
    %c0_i32 = arith.constant 0 : i32
    %c0_i32_0 = arith.constant 0 : i32
    return %arg0, %c0_i32 : i32, i32
  }
  func.func @transform_2(%arg0: i32) -> (i32, i32) {
    %c0_i32 = arith.constant 0 : i32
    %c0_i32_0 = arith.constant 0 : i32
    %c0_i32_1 = arith.constant 0 : i32
    return %c0_i32, %c0_i32_0 : i32, i32
  }
  func.func @transform_3(%arg0: i32) -> (i32, i32) {
    %c0_i32 = arith.constant 0 : i32
    %c0_i32_0 = arith.constant 0 : i32
    return %arg0, %c0_i32 : i32, i32
  }
}

</mosaic_0001>

<bundles_post_ra>
// kernel: tpu_custom_call.1
= control target key start
LH: loop header
LB: loop body
LE: loop exit
PB: predicated region body
PF: predicated region fallthrough
CT: control target
= control target key end

     0   :  { %vm22_vm0 = vcmask 31744   ;;  %vm102_vm1 = vcmask 7168   ;;  %s214_s0 = inlined_call_operand.vmem [shape: f32[32,4], index: 0, kind: input, shape index: {}]   ;;  %s215_s1 = inlined_call_operand.vmem [shape: f32[32,4], index: 1, kind: input, shape index: {}]   ;;  %s216_s2 = inlined_call_operand.vmem [shape: f32[1,4], index: 2, kind: input, shape index: {}]   ;;  %s217_s3 = inlined_call_operand.vmem [shape: f32[32,1], index: 3, kind: output, shape index: {}]  }
   0x1   :  { %v14_v0 = vld [vmem:[%s214_s0] sm:$0xff]  ;;  %v154_v1 = vld [vmem:[%s214_s0 + $0x10] sm:$0xff]  ;;  %v159_v2 = vld [vmem:[%s214_s0 + $0x8] sm:$0xff] }
   0x2   :  { %v23_v3 = vsel %vm22_vm0, %v14_v0, -inf  ;;  %v29_v4 = vsel %vm22_vm0, %v154_v1, -inf  ;;  %v167_v5 = vld [vmem:[%s214_s0 + $0x18] sm:$0xff]  ;;  %v26_v6 = vsel %vm22_vm0, %v159_v2, -inf  ;;  %v18_v36 = vld [vmem:[%s215_s1] sm:$0xff]  ;;  %v19_v46 = vld [vmem:[%s215_s1 + $0x8] sm:$0xff] }
   0x3   :  { %24 = vmax.xlane.f32.xlu0 %v23_v3  ;;  %30 = vmax.xlane.f32.xlu1 %v29_v4  ;;  %v32_v7 = vsel %vm22_vm0, %v167_v5, -inf  ;;  %v111_v41 = vld [vmem:[%s216_s2] ss:$0 sm:$0xff]  ;;  %v20_v50 = vld [vmem:[%s215_s1 + $0x10] sm:$0xff]  ;;  %v21_v56 = vld [vmem:[%s215_s1 + $0x18] sm:$0xff] }
   0x7   :  { %27 = vmax.xlane.f32.xlu0 %v26_v6  ;;  %33 = vmax.xlane.f32.xlu1 %v32_v7 }
  0x90   :  { %v25_v8 = vpop.xlane.xlu0 %24  ;;  %v31_v9 = vpop.xlane.xlu1 %30 }
  0x91   :  { %v35_v10 = vsub.f32 %v14_v0, %v25_v8  ;;  %v37_v11 = vsub.f32 %v154_v1, %v31_v9 }
  0x93   :  { %v39_v12 = vmul.f32 1.442695, %v35_v10  ;;  %v43_v13 = vmul.f32 1.442695, %v37_v11 }
  0x94   :  { %v28_v14 = vpop.xlane.xlu0 %27  ;;  %v34_v15 = vpop.xlane.xlu1 %33 }
  0x95   :  { %112 = vpow2.f32 %v39_v12  ;;  %v36_v16 = vsub.f32 %v159_v2, %v28_v14  ;;  %v38_v17 = vsub.f32 %v167_v5, %v34_v15 }
  0x96   :  { %114 = vpow2.f32 %v43_v13 }
  0x97   :  { %v41_v18 = vmul.f32 1.442695, %v36_v16  ;;  %v45_v19 = vmul.f32 1.442695, %v38_v17 }
  0x99   :  { %116 = vpow2.f32 %v41_v18 }
  0x9a   :  { %118 = vpow2.f32 %v45_v19 }
  0x9f   :  { %v113_v20 = vpop.eup %112 }
  0xa0   :  { %v115_v21 = vpop.eup %114  ;;  %v47_v22 = vsel %vm22_vm0, %v113_v20, 0.0 }
  0xa1   :  { %48 = vadd.xlane.f32.xlu0 %v47_v22  ;;  %v53_v23 = vsel %vm22_vm0, %v115_v21, 0.0 }
  0xa3   :  { %v117_v24 = vpop.eup %116 }
  0xa4   :  { %v119_v25 = vpop.eup %118  ;;  %v50_v26 = vsel %vm22_vm0, %v117_v24, 0.0 }
  0xa5   :  { %54 = vadd.xlane.f32.xlu0 %v53_v23  ;;  %51 = vadd.xlane.f32.xlu1 %v50_v26  ;;  %v56_v27 = vsel %vm22_vm0, %v119_v25, 0.0 }
  0xa9   :  { %57 = vadd.xlane.f32.xlu1 %v56_v27 }
 0x12e   :  { %v49_v28 = vpop.xlane.xlu0 %48 }
 0x12f   :  { %120 = vlog2.f32 %v49_v28 }
 0x132   :  { %v52_v29 = vpop.xlane.xlu1 %51  ;;  %v55_v30 = vpop.xlane.xlu0 %54 }
 0x133   :  { %122 = vlog2.f32 %v52_v29 }
 0x134   :  { %124 = vlog2.f32 %v55_v30 }
 0x136   :  { %v58_v31 = vpop.xlane.xlu1 %57 }
 0x137   :  { %126 = vlog2.f32 %v58_v31 }
 0x139   :  { %v121_v32 = vpop.eup %120 }
 0x13a   :  { %v60_v33 = vmul.f32 0.6931472, %v121_v32 }
 0x13c   :  { %v67_v34 = vadd.f32 %v60_v33, %v25_v8 }
 0x13d   :  { %v123_v35 = vpop.eup %122 }
 0x13e   :  { %v125_v37 = vpop.eup %124  ;;  %v62_v38 = vmul.f32 0.6931472, %v123_v35  ;;  %v71_v39 = vsub.f32 %v67_v34, %v14_v0 }
 0x13f   :  { %v64_v40 = vmul.f32 0.6931472, %v125_v37 }
 0x140   :  { %v68_v42 = vadd.f32 %v62_v38, %v28_v14  ;;  %v75_v43 = vmul.f32 %v71_v39, %v18_v36 }
 0x141   :  { %v127_v44 = vpop.eup %126  ;;  %v69_v45 = vadd.f32 %v64_v40, %v31_v9 }
 0x142   :  { %v66_v47 = vmul.f32 0.6931472, %v127_v44  ;;  %v86_v48 = vmul.f32 %v111_v41, %v75_v43  ;;  %v72_v49 = vsub.f32 %v68_v42, %v159_v2 }
 0x143   :  { %v73_v51 = vsub.f32 %v69_v45, %v154_v1 }
 0x144   :  { %v70_v52 = vadd.f32 %v66_v47, %v34_v15  ;;  %v90_v53 = vsel %vm22_vm0, %v86_v48, 0.0  ;;  %v76_v54 = vmul.f32 %v72_v49, %v19_v46 }
 0x145   :  { %91 = vadd.xlane.f32.xlu0 %v90_v53  ;;  %v77_v55 = vmul.f32 %v73_v51, %v20_v50 }
 0x146   :  { %v87_v57 = vmul.f32 %v111_v41, %v76_v54  ;;  %v74_v58 = vsub.f32 %v70_v52, %v167_v5 }
 0x147   :  { %v88_v59 = vmul.f32 %v111_v41, %v77_v55 }
 0x148   :  { %v93_v60 = vsel %vm22_vm0, %v87_v57, 0.0  ;;  %v78_v61 = vmul.f32 %v74_v58, %v21_v56 }
 0x149   :  { %94 = vadd.xlane.f32.xlu1 %v93_v60  ;;  %v96_v62 = vsel %vm22_vm0, %v88_v59, 0.0 }
 0x14a   :  { %97 = vadd.xlane.f32.xlu0 %v96_v62  ;;  %v89_v63 = vmul.f32 %v111_v41, %v78_v61 }
 0x14c   :  { %v99_v0 = vsel %vm22_vm0, %v89_v63, 0.0 }
 0x14d   :  { %100 = vadd.xlane.f32.xlu1 %v99_v0 }
 0x1d2   :  { %v92_v1 = vpop.xlane.xlu0 %91 }
 0x1d3   :  { %103 = vst.msk [vmem:[%s217_s3] sm:$0xff] %vm102_vm1, %v92_v1 }
 0x1d6   :  { %v95_v2 = vpop.xlane.xlu1 %94 }
 0x1d7   :  { %104 = vst.msk [vmem:[%s217_s3 + $0x8] sm:$0xff] %vm102_vm1, %v95_v2  ;;  %v98_v3 = vpop.xlane.xlu0 %97 }
 0x1d8   :  { %105 = vst.msk [vmem:[%s217_s3 + $0x10] sm:$0xff] %vm102_vm1, %v98_v3 }
 0x1da   :  { %v101_v4 = vpop.xlane.xlu1 %100 }
 0x1db   :  { %106 = vst.msk [vmem:[%s217_s3 + $0x18] sm:$0xff] %vm102_vm1, %v101_v4 }

</bundles_post_ra>
